<compile_context>
chip_gen: v7x
topology: tpu7x:2x2x1
jax: 0.10.0
libtpu: 0.0.40
codegen_flags: <defaults>
</compile_context>

<pallas_src>
import jax
import jax.numpy as jnp
from jax.experimental import pallas as pl
from jax.experimental.pallas import tpu as pltpu

# ---- model hyperparameters (small, consistent with the module) ----
NUM_HEADS = 4
HIDDEN = 32
HEAD = HIDDEN // NUM_HEADS
SCALE = HIDDEN ** (-0.5)     # faithful to the module: hidden_dim ** (-0.5)
BATCH = 2
NODES = 8
# TODO(synk): att_dropout is a no-op in eval mode; dropout is not applied here.


def _mha_kernel(x_ref, prior_ref, wq_ref, wk_ref, wv_ref, bv_ref, wo_ref,
                o_ref):
    B, N, _ = prior_ref.shape
    G = NUM_HEADS * B                                  # flattened (head, batch)

    x2 = x_ref[...]                                    # (B*N, H)

    # --- fused QKV projections: one MXU matmul each over all B*N rows ---
    q2 = jnp.dot(x2, wq_ref[...], preferred_element_type=jnp.float32)
    k2 = jnp.dot(x2, wk_ref[...], preferred_element_type=jnp.float32)
    v2 = (jnp.dot(x2, wv_ref[...], preferred_element_type=jnp.float32)
          + bv_ref[...])

    # --- single relayout (B*N, H) -> (NUM_HEADS*B, N, HEAD); g = h*B + b ---
    def to_heads(t2):
        parts = [t2[:, h * HEAD:(h + 1) * HEAD].reshape(B, N, HEAD)
                 for h in range(NUM_HEADS)]
        return jnp.concatenate(parts, axis=0)

    q_g = to_heads(q2)                                 # (G, N, HEAD)
    k_g = to_heads(k2)
    v_g = to_heads(v2)

    # prior broadcast over heads, same g = h*B + b ordering (major-dim ops only)
    prior_g = jnp.broadcast_to(prior_ref[...][None],
                               (NUM_HEADS, B, N, N)).reshape(G, N, N)

    # --- scores for all (head, batch) pairs: one batched dot_general ---
    s = jax.lax.dot_general(q_g, k_g, (((2,), (2,)), ((0,), (0,))),
                            preferred_element_type=jnp.float32)  # (G, N, N)

    # pad_mask on RAW scores (before scale/prior), one fused reduce per row
    pad_mask = jnp.max(jnp.abs(s), axis=-1, keepdims=True) == 0.0  # (G, N, 1)

    s = s * SCALE + prior_g

    # --- one fused softmax over the last axis ---
    m = jnp.max(s, axis=-1, keepdims=True)
    p = jnp.exp(s - m)
    denom = jnp.sum(p, axis=-1, keepdims=True)
    attn = p * pl.reciprocal(denom, approx=False)
    # fully-padded rows -> exactly 0 (== reference's softmax(-inf)+nan_to_num)
    attn = jnp.where(pad_mask, 0.0, attn)

    # --- context for all (head, batch) pairs: one batched dot_general ---
    ctx_g = jax.lax.dot_general(attn, v_g, (((2,), (1,)), ((0,), (0,))),
                                preferred_element_type=jnp.float32)  # (G,N,HEAD)

    # --- single relayout back to (B*N, H) + one output matmul ---
    ctx2 = jnp.concatenate(
        [ctx_g[h * B:(h + 1) * B].reshape(B * N, HEAD)
         for h in range(NUM_HEADS)],
        axis=-1)                                       # (B*N, H)
    out2 = jnp.dot(ctx2, wo_ref[...], preferred_element_type=jnp.float32)
    o_ref[...] = out2.astype(o_ref.dtype)


@jax.jit
def graphormer_mha(x, prior, wq_t, wk_t, wv_t, bv, wo_t):
    B, N, H = x.shape
    x2 = x.reshape(B * N, H)                           # free, contiguous
    vmem_specs = [pl.BlockSpec(memory_space=pltpu.MemorySpace.VMEM)
                  for _ in range(7)]
    out2 = pl.pallas_call(
        _mha_kernel,
        out_shape=jax.ShapeDtypeStruct((B * N, H), x.dtype),
        in_specs=vmem_specs,
        out_specs=pl.BlockSpec(memory_space=pltpu.MemorySpace.VMEM),
    )(x2, prior, wq_t, wk_t, wv_t, bv, wo_t)
    return out2.reshape(B, N, H)


def _reference(x, prior, wq_t, wk_t, wv_t, bv, wo_t):
    """Pure-JAX re-statement of the torch forward for verification."""
    B, N, H = x.shape
    q = (x @ wq_t).reshape(B, N, NUM_HEADS, HEAD)
    k = (x @ wk_t).reshape(B, N, NUM_HEADS, HEAD)
    v = (x @ wv_t + bv).reshape(B, N, NUM_HEADS, HEAD)
    a = jnp.einsum('bnhd,bmhd->bhnm', q, k)
    pad_mask = jnp.all(a == 0, axis=-1)
    a = a * SCALE + prior[:, None, :, :]
    a = jnp.where(pad_mask[..., None], -jnp.inf, a)
    a = jax.nn.softmax(a, axis=-1)
    a = jnp.nan_to_num(a)
    ctx = jnp.einsum('bhnm,bmhd->bnhd', a, v).reshape(B, N, H)
    return ctx @ wo_t


if __name__ == "__main__":
    key = jax.random.PRNGKey(0)
    k_x, k_p, k_wq, k_wk, k_wv, k_bv, k_wo = jax.random.split(key, 7)

    x = jax.random.normal(k_x, (BATCH, NODES, HIDDEN), dtype=jnp.float32)
    # zero out the last two "padding" nodes so the pad_mask path is exercised
    node_valid = (jnp.arange(NODES) < NODES - 2).astype(jnp.float32)
    x = x * node_valid[None, :, None]

    prior = 0.1 * jax.random.normal(k_p, (BATCH, NODES, NODES),
                                    dtype=jnp.float32)

    # nn.Linear weights are (out, in); store transposed (in, out).
    init = 1.0 / jnp.sqrt(HIDDEN)
    wq_t = init * jax.random.normal(k_wq, (HIDDEN, HIDDEN), dtype=jnp.float32)
    wk_t = init * jax.random.normal(k_wk, (HIDDEN, HIDDEN), dtype=jnp.float32)
    wv_t = init * jax.random.normal(k_wv, (HIDDEN, HIDDEN), dtype=jnp.float32)
    bv = init * jax.random.normal(k_bv, (1, HIDDEN), dtype=jnp.float32)
    wo_t = init * jax.random.normal(k_wo, (HIDDEN, HIDDEN), dtype=jnp.float32)

    out = graphormer_mha(x, prior, wq_t, wk_t, wv_t, bv, wo_t)
    out = jax.block_until_ready(out)

    ref = _reference(x, prior, wq_t, wk_t, wv_t, bv, wo_t)
    assert out.shape == (BATCH, NODES, HIDDEN)
    assert jnp.allclose(out, ref, atol=1e-5, rtol=1e-5), "mismatch vs reference"

    print("KERNEL_OK")
</pallas_src>

<mosaic_0001>
module attributes {stable_mosaic.version = 11 : i64} {
  func.func @_mha_kernel(%arg0: memref<16x32xf32, #tpu.memory_space<vmem>>, %arg1: memref<2x8x8xf32, #tpu.memory_space<vmem>>, %arg2: memref<32x32xf32, #tpu.memory_space<vmem>>, %arg3: memref<32x32xf32, #tpu.memory_space<vmem>>, %arg4: memref<32x32xf32, #tpu.memory_space<vmem>>, %arg5: memref<1x32xf32, #tpu.memory_space<vmem>>, %arg6: memref<32x32xf32, #tpu.memory_space<vmem>>, %arg7: memref<16x32xf32, #tpu.memory_space<vmem>>) attributes {dimension_semantics = [], scalar_prefetch = 0 : i64, scratch_operands = 0 : i64, tpu.core_type = #tpu.core_type<tc>} {
    %c0 = arith.constant 0 : index
    %c0_0 = arith.constant 0 : index
    %0 = vector.load %arg0[%c0, %c0_0] : memref<16x32xf32, #tpu.memory_space<vmem>>, vector<16x32xf32>
    %c0_1 = arith.constant 0 : index
    %c0_2 = arith.constant 0 : index
    %1 = vector.load %arg2[%c0_1, %c0_2] : memref<32x32xf32, #tpu.memory_space<vmem>>, vector<32x32xf32>
    %cst = arith.constant dense<0.000000e+00> : vector<16x32xf32>
    %2 = tpu.matmul %0, %1, %cst {dimension_numbers = #tpu.dot_dimension_numbers<[1], [0], [0], [1], [0, 0, 1, 1], [], []>} : vector<16x32xf32>, vector<32x32xf32>, vector<16x32xf32> -> vector<16x32xf32>
    %c0_3 = arith.constant 0 : index
    %c0_4 = arith.constant 0 : index
    %3 = vector.load %arg3[%c0_3, %c0_4] : memref<32x32xf32, #tpu.memory_space<vmem>>, vector<32x32xf32>
    %cst_5 = arith.constant dense<0.000000e+00> : vector<16x32xf32>
    %4 = tpu.matmul %0, %3, %cst_5 {dimension_numbers = #tpu.dot_dimension_numbers<[1], [0], [0], [1], [0, 0, 1, 1], [], []>} : vector<16x32xf32>, vector<32x32xf32>, vector<16x32xf32> -> vector<16x32xf32>
    %c0_6 = arith.constant 0 : index
    %c0_7 = arith.constant 0 : index
    %5 = vector.load %arg4[%c0_6, %c0_7] : memref<32x32xf32, #tpu.memory_space<vmem>>, vector<32x32xf32>
    %cst_8 = arith.constant dense<0.000000e+00> : vector<16x32xf32>
    %6 = tpu.matmul %0, %5, %cst_8 {dimension_numbers = #tpu.dot_dimension_numbers<[1], [0], [0], [1], [0, 0, 1, 1], [], []>} : vector<16x32xf32>, vector<32x32xf32>, vector<16x32xf32> -> vector<16x32xf32>
    %c0_9 = arith.constant 0 : index
    %c0_10 = arith.constant 0 : index
    %7 = vector.load %arg5[%c0_9, %c0_10] : memref<1x32xf32, #tpu.memory_space<vmem>>, vector<1x32xf32>
    %8 = vector.broadcast %7 : vector<1x32xf32> to vector<16x32xf32>
    %9 = arith.addf %6, %8 : vector<16x32xf32>
    %10 = vector.extract_strided_slice %2 {offsets = [0, 0], sizes = [16, 8], strides = [1, 1]} : vector<16x32xf32> to vector<16x8xf32>
    %11 = vector.shape_cast %10 : vector<16x8xf32> to vector<2x8x8xf32>
    %12 = vector.extract_strided_slice %2 {offsets = [0, 8], sizes = [16, 8], strides = [1, 1]} : vector<16x32xf32> to vector<16x8xf32>
    %13 = vector.shape_cast %12 : vector<16x8xf32> to vector<2x8x8xf32>
    %14 = vector.extract_strided_slice %2 {offsets = [0, 16], sizes = [16, 8], strides = [1, 1]} : vector<16x32xf32> to vector<16x8xf32>
    %15 = vector.shape_cast %14 : vector<16x8xf32> to vector<2x8x8xf32>
    %16 = vector.extract_strided_slice %2 {offsets = [0, 24], sizes = [16, 8], strides = [1, 1]} : vector<16x32xf32> to vector<16x8xf32>
    %17 = vector.shape_cast %16 : vector<16x8xf32> to vector<2x8x8xf32>
    %18 = tpu.concatenate %11, %13, %15, %17 in 0 : vector<2x8x8xf32>, vector<2x8x8xf32>, vector<2x8x8xf32>, vector<2x8x8xf32> -> vector<8x8x8xf32>
    %19 = vector.extract_strided_slice %4 {offsets = [0, 0], sizes = [16, 8], strides = [1, 1]} : vector<16x32xf32> to vector<16x8xf32>
    %20 = vector.shape_cast %19 : vector<16x8xf32> to vector<2x8x8xf32>
    %21 = vector.extract_strided_slice %4 {offsets = [0, 8], sizes = [16, 8], strides = [1, 1]} : vector<16x32xf32> to vector<16x8xf32>
    %22 = vector.shape_cast %21 : vector<16x8xf32> to vector<2x8x8xf32>
    %23 = vector.extract_strided_slice %4 {offsets = [0, 16], sizes = [16, 8], strides = [1, 1]} : vector<16x32xf32> to vector<16x8xf32>
    %24 = vector.shape_cast %23 : vector<16x8xf32> to vector<2x8x8xf32>
    %25 = vector.extract_strided_slice %4 {offsets = [0, 24], sizes = [16, 8], strides = [1, 1]} : vector<16x32xf32> to vector<16x8xf32>
    %26 = vector.shape_cast %25 : vector<16x8xf32> to vector<2x8x8xf32>
    %27 = tpu.concatenate %20, %22, %24, %26 in 0 : vector<2x8x8xf32>, vector<2x8x8xf32>, vector<2x8x8xf32>, vector<2x8x8xf32> -> vector<8x8x8xf32>
    %28 = vector.extract_strided_slice %9 {offsets = [0, 0], sizes = [16, 8], strides = [1, 1]} : vector<16x32xf32> to vector<16x8xf32>
    %29 = vector.shape_cast %28 : vector<16x8xf32> to vector<2x8x8xf32>
    %30 = vector.extract_strided_slice %9 {offsets = [0, 8], sizes = [16, 8], strides = [1, 1]} : vector<16x32xf32> to vector<16x8xf32>
    %31 = vector.shape_cast %30 : vector<16x8xf32> to vector<2x8x8xf32>
    %32 = vector.extract_strided_slice %9 {offsets = [0, 16], sizes = [16, 8], strides = [1, 1]} : vector<16x32xf32> to vector<16x8xf32>
    %33 = vector.shape_cast %32 : vector<16x8xf32> to vector<2x8x8xf32>
    %34 = vector.extract_strided_slice %9 {offsets = [0, 24], sizes = [16, 8], strides = [1, 1]} : vector<16x32xf32> to vector<16x8xf32>
    %35 = vector.shape_cast %34 : vector<16x8xf32> to vector<2x8x8xf32>
    %36 = tpu.concatenate %29, %31, %33, %35 in 0 : vector<2x8x8xf32>, vector<2x8x8xf32>, vector<2x8x8xf32>, vector<2x8x8xf32> -> vector<8x8x8xf32>
    %c0_11 = arith.constant 0 : index
    %c0_12 = arith.constant 0 : index
    %c0_13 = arith.constant 0 : index
    %37 = vector.load %arg1[%c0_11, %c0_12, %c0_13] : memref<2x8x8xf32, #tpu.memory_space<vmem>>, vector<2x8x8xf32>
    %38 = vector.shape_cast %37 : vector<2x8x8xf32> to vector<1x2x8x8xf32>
    %39 = vector.shape_cast %38 : vector<1x2x8x8xf32> to vector<1x2x8x8xf32>
    %40 = vector.broadcast %39 : vector<1x2x8x8xf32> to vector<4x2x8x8xf32>
    %41 = vector.shape_cast %40 : vector<4x2x8x8xf32> to vector<8x8x8xf32>
    %cst_14 = arith.constant dense<0.000000e+00> : vector<8x8x8xf32>
    %42 = tpu.matmul %18, %27, %cst_14 {dimension_numbers = #tpu.dot_dimension_numbers<[2], [2], [1], [1], [0, 0, 0, 1, 1, 1], [0], [0]>} : vector<8x8x8xf32>, vector<8x8x8xf32>, vector<8x8x8xf32> -> vector<8x8x8xf32>
    %43 = math.absf %42 : vector<8x8x8xf32>
    %cst_15 = arith.constant dense<0xFF800000> : vector<8x8xf32>
    %44 = vector.multi_reduction <maximumf>, %43, %cst_15 [2] : vector<8x8x8xf32> to vector<8x8xf32>
    %45 = vector.shape_cast %44 : vector<8x8xf32> to vector<8x8x1xf32>
    %cst_16 = arith.constant 0.000000e+00 : f32
    %46 = vector.broadcast %cst_16 : f32 to vector<8x8x1xf32>
    %47 = arith.cmpf oeq, %45, %46 : vector<8x8x1xf32>
    %cst_17 = arith.constant 0.176776692 : f32
    %48 = vector.broadcast %cst_17 : f32 to vector<8x8x8xf32>
    %49 = arith.mulf %42, %48 : vector<8x8x8xf32>
    %50 = arith.addf %49, %41 : vector<8x8x8xf32>
    %cst_18 = arith.constant dense<0xFF800000> : vector<8x8xf32>
    %51 = vector.multi_reduction <maximumf>, %50, %cst_18 [2] : vector<8x8x8xf32> to vector<8x8xf32>
    %52 = vector.shape_cast %51 : vector<8x8xf32> to vector<8x8x1xf32>
    %53 = vector.broadcast %52 : vector<8x8x1xf32> to vector<8x8x8xf32>
    %54 = arith.subf %50, %53 : vector<8x8x8xf32>
    %55 = math.exp %54 : vector<8x8x8xf32>
    %cst_19 = arith.constant dense<0.000000e+00> : vector<8x8xf32>
    %56 = vector.multi_reduction <add>, %55, %cst_19 [2] : vector<8x8x8xf32> to vector<8x8xf32>
    %57 = vector.shape_cast %56 : vector<8x8xf32> to vector<8x8x1xf32>
    %58 = tpu.reciprocal %57 : vector<8x8x1xf32> -> vector<8x8x1xf32>
    %59 = vector.broadcast %58 : vector<8x8x1xf32> to vector<8x8x8xf32>
    %60 = arith.mulf %55, %59 : vector<8x8x8xf32>
    %cst_20 = arith.constant 0.000000e+00 : f32
    %61 = vector.shape_cast %47 : vector<8x8x1xi1> to vector<8x8x1xi1>
    %62 = vector.broadcast %61 : vector<8x8x1xi1> to vector<8x8x8xi1>
    %63 = vector.broadcast %cst_20 : f32 to vector<8x8x8xf32>
    %64 = arith.select %62, %63, %60 : vector<8x8x8xi1>, vector<8x8x8xf32>
    %cst_21 = arith.constant dense<0.000000e+00> : vector<8x8x8xf32>
    %65 = tpu.matmul %64, %36, %cst_21 {dimension_numbers = #tpu.dot_dimension_numbers<[2], [1], [1], [2], [0, 0, 0, 1, 1, 2], [0], [0]>} : vector<8x8x8xf32>, vector<8x8x8xf32>, vector<8x8x8xf32> -> vector<8x8x8xf32>
    %66 = vector.extract_strided_slice %65 {offsets = [0, 0, 0], sizes = [2, 8, 8], strides = [1, 1, 1]} : vector<8x8x8xf32> to vector<2x8x8xf32>
    %67 = vector.shape_cast %66 : vector<2x8x8xf32> to vector<16x8xf32>
    %68 = vector.extract_strided_slice %65 {offsets = [2, 0, 0], sizes = [2, 8, 8], strides = [1, 1, 1]} : vector<8x8x8xf32> to vector<2x8x8xf32>
    %69 = vector.shape_cast %68 : vector<2x8x8xf32> to vector<16x8xf32>
    %70 = vector.extract_strided_slice %65 {offsets = [4, 0, 0], sizes = [2, 8, 8], strides = [1, 1, 1]} : vector<8x8x8xf32> to vector<2x8x8xf32>
    %71 = vector.shape_cast %70 : vector<2x8x8xf32> to vector<16x8xf32>
    %72 = vector.extract_strided_slice %65 {offsets = [6, 0, 0], sizes = [2, 8, 8], strides = [1, 1, 1]} : vector<8x8x8xf32> to vector<2x8x8xf32>
    %73 = vector.shape_cast %72 : vector<2x8x8xf32> to vector<16x8xf32>
    %74 = tpu.concatenate %67, %69, %71, %73 in 1 : vector<16x8xf32>, vector<16x8xf32>, vector<16x8xf32>, vector<16x8xf32> -> vector<16x32xf32>
    %c0_22 = arith.constant 0 : index
    %c0_23 = arith.constant 0 : index
    %75 = vector.load %arg6[%c0_22, %c0_23] : memref<32x32xf32, #tpu.memory_space<vmem>>, vector<32x32xf32>
    %cst_24 = arith.constant dense<0.000000e+00> : vector<16x32xf32>
    %76 = tpu.matmul %74, %75, %cst_24 {dimension_numbers = #tpu.dot_dimension_numbers<[1], [0], [0], [1], [0, 0, 1, 1], [], []>} : vector<16x32xf32>, vector<32x32xf32>, vector<16x32xf32> -> vector<16x32xf32>
    %c0_25 = arith.constant 0 : index
    %c0_26 = arith.constant 0 : index
    %77 = vector.load %arg7[%c0_25, %c0_26] : memref<16x32xf32, #tpu.memory_space<vmem>>, vector<16x32xf32>
    tpu.vector_store %arg7[%c0_25, %c0_26], %76 {strides = array<i32>} : memref<16x32xf32, #tpu.memory_space<vmem>>, vector<16x32xf32>,
    return
  }
}

</mosaic_0001>

<bundles_post_ra>
// kernel: graphormer_mha.1
= control target key start
LH: loop header
LB: loop body
LE: loop exit
PB: predicated region body
PF: predicated region fallthrough
CT: control target
= control target key end

     0   :  { %12 = vsyncpa [#allocation3], 0  ;;  %s2751_s0 = inlined_call_operand.hbm [shape: f32[16,32], index: 0, kind: input, shape index: {}]   ;;  %s2752_s1 = inlined_call_operand.hbm [shape: f32[2,8,8], index: 1, kind: input, shape index: {}]   ;;  %s2753_s2 = inlined_call_operand.hbm [shape: f32[32,32], index: 2, kind: input, shape index: {}]   ;;  %s2754_s3 = inlined_call_operand.hbm [shape: f32[32,32], index: 3, kind: input, shape index: {}]   ;;  %s2755_s4 = inlined_call_operand.hbm [shape: f32[32,32], index: 4, kind: input, shape index: {}]   ;;  %s2756_s5 = inlined_call_operand.vmem [shape: f32[1,32], index: 5, kind: input, shape index: {}]   ;;  %s2757_s6 = inlined_call_operand.hbm [shape: f32[32,32], index: 6, kind: input, shape index: {}]   ;;  %s2758_s7 = inlined_call_operand.hbm [shape: f32[16,32], index: 7, kind: output, shape index: {}]  }
   0x1   :  { %13 = vsyncpa [#allocation6], 0 }
   0x2   :  { %14 = vsyncpa [#allocation9], 0 }
   0x3   :  { %15 = vsyncpa [#allocation12], 0 }
   0x4   :  { %16 = vsyncpa [#allocation4], 0  ;;  %s2353_s24 = smov [#allocation5]   ;;  %s2354_s26 = smov [#allocation8]  }
   0x5   :  { %s34_s25 = sshll.u32 %s2353_s24, 4  ;;  %s58_s27 = sshll.u32 %s2354_s26, 4  ;;  %s35_s25 = int_to_ptr.vmem [resolvable:$true] %s34_s25  ;;  %s2409_s27 = int_to_ptr.vmem [resolvable:$true] %s58_s27 }
   0x6   :  { %s2189_s30 = scalar_lea.hbm %s2752_s1, 256 }
   0x7   :  { %p2190_p0 = scmp.ne.s32.totalorder %s2752_s1, %s2189_s30  ;;  %p2193_p1 = scmp.lt.u32.totalorder %s2189_s30, %s2752_s1 }
   0x9   :  { %p2195_p2 = pnand %p2193_p1, %p2190_p0 }
   0xb   :  { %2198 = shalt.err (!%p2195_p2)
}
   0xc   :  { %s2199_s12 = scalar_lea.vmem %s35_s25, 256  ;;  %p2204_p4 = scmp.lt.s32.totalorder %s35_s25, %s35_s25 }
   0xd   :  { %p2200_p3 = scmp.ne.s32.totalorder %s35_s25, %s2199_s12  ;;  %p2205_p5 = scmp.lt.s32.totalorder %s2199_s12, %s2199_s12 }
   0xf   :  { %p2206_p6 = por %p2205_p5, %p2204_p4 }
  0x11   :  { %p2207_p7 = pnand %p2206_p6, %p2200_p3 }
  0x13   :  { %2210 = shalt.err (!%p2207_p7)
}
  0x14   :  { %s2355_s13 = smov 128   ;;  %s2356_s14 = smov 8  }
  0x15   :  { %40 = dma.hbm_to_vmem [thread:$0]  %s2752_s1, 256, %s35_s25, [#allocation6], %s2355_s13, %s2355_s13, %s2356_s14  }
  0x16   :  { %s2211_s19 = scalar_lea.hbm %s2754_s3, 512 }
  0x17   :  { %p2212_p8 = scmp.ne.s32.totalorder %s2754_s3, %s2211_s19  ;;  %p2215_p9 = scmp.lt.u32.totalorder %s2211_s19, %s2754_s3 }
  0x19   :  { %p2217_p10 = pnand %p2215_p9, %p2212_p8 }
  0x1b   :  { %2220 = shalt.err (!%p2217_p10)
}
  0x1c   :  { %s2221_s24 = scalar_lea.vmem %s2409_s27, 512  ;;  %p2226_p12 = scmp.lt.s32.totalorder %s2409_s27, %s2409_s27 }
  0x1d   :  { %p2222_p11 = scmp.ne.s32.totalorder %s2409_s27, %s2221_s24  ;;  %p2227_p13 = scmp.lt.s32.totalorder %s2221_s24, %s2221_s24 }
  0x1f   :  { %p2228_p0 = por %p2227_p13, %p2226_p12 }
  0x21   :  { %p2229_p1 = pnand %p2228_p0, %p2222_p11 }
  0x23   :  { %2232 = shalt.err (!%p2229_p1)
}
  0x24   :  { %64 = dma.hbm_to_vmem [thread:$0]  %s2754_s3, 512, %s2409_s27, [#allocation9], %s2355_s13, %s2355_s13, %s2356_s14  }
  0x25   :  { %s2357_s26 = smov [#allocation2]   ;;  %s2358_s29 = smov [#allocation7]  }
  0x26   :  { %s22_s28 = sshll.u32 %s2357_s26, 4  ;;  %s46_s30 = sshll.u32 %s2358_s29, 4  ;;  %s23_s28 = int_to_ptr.vmem [resolvable:$true] %s22_s28  ;;  %s2446_s30 = int_to_ptr.vmem [resolvable:$true] %s46_s30 }
  0x27   :  { %s2233_s10 = scalar_lea.hbm %s2751_s0, 256 }
  0x28   :  { %p2234_p2 = scmp.ne.s32.totalorder %s2751_s0, %s2233_s10  ;;  %p2237_p3 = scmp.lt.u32.totalorder %s2233_s10, %s2751_s0 }
  0x2a   :  { %p2239_p4 = pnand %p2237_p3, %p2234_p2 }
  0x2c   :  { %2242 = shalt.err (!%p2239_p4)
}
  0x2d   :  { %s2243_s3 = scalar_lea.vmem %s23_s28, 256  ;;  %p2248_p6 = scmp.lt.s32.totalorder %s23_s28, %s23_s28 }
  0x2e   :  { %p2244_p5 = scmp.ne.s32.totalorder %s23_s28, %s2243_s3  ;;  %p2249_p7 = scmp.lt.s32.totalorder %s2243_s3, %s2243_s3 }
  0x30   :  { %p2250_p8 = por %p2249_p7, %p2248_p6 }
  0x32   :  { %p2251_p9 = pnand %p2250_p8, %p2244_p5 }
  0x34   :  { %2254 = shalt.err (!%p2251_p9)
}
  0x35   :  { %28 = dma.hbm_to_vmem [thread:$0]  %s2751_s0, 256, %s23_s28, [#allocation3], %s2355_s13, %s2355_s13, %s2356_s14  }
  0x36   :  { %s2255_s20 = scalar_lea.hbm %s2753_s2, 512 }
  0x37   :  { %p2256_p10 = scmp.ne.s32.totalorder %s2753_s2, %s2255_s20  ;;  %p2259_p11 = scmp.lt.u32.totalorder %s2255_s20, %s2753_s2 }
  0x39   :  { %p2261_p12 = pnand %p2259_p11, %p2256_p10 }
  0x3b   :  { %2264 = shalt.err (!%p2261_p12)
}
  0x3c   :  { %s2265_s1 = scalar_lea.vmem %s2446_s30, 512  ;;  %p2270_p0 = scmp.lt.s32.totalorder %s2446_s30, %s2446_s30 }
  0x3d   :  { %p2266_p13 = scmp.ne.s32.totalorder %s2446_s30, %s2265_s1  ;;  %p2271_p1 = scmp.lt.s32.totalorder %s2265_s1, %s2265_s1 }
  0x3f   :  { %p2272_p2 = por %p2271_p1, %p2270_p0 }
  0x41   :  { %p2273_p3 = pnand %p2272_p2, %p2266_p13 }
  0x43   :  { %2276 = shalt.err (!%p2273_p3)
}
  0x44   :  { %52 = dma.hbm_to_vmem [thread:$0]  %s2753_s2, 512, %s2446_s30, [#allocation6], %s2355_s13, %s2355_s13, %s2356_s14  }
  0x45   :  { %s2359_s26 = smov [#allocation10]   ;;  %s2360_s29 = smov [#allocation11]  }
  0x46   :  { %s70_s28 = sshll.u32 %s2359_s26, 4  ;;  %s84_s8 = sshll.u32 %s2360_s29, 4  ;;  %s71_s28 = int_to_ptr.vmem [resolvable:$true] %s70_s28  ;;  %s2483_s8 = int_to_ptr.vmem [resolvable:$true] %s84_s8 }
  0x47   :  { %s2277_s11 = scalar_lea.hbm %s2755_s4, 512 }
  0x48   :  { %p2278_p4 = scmp.ne.s32.totalorder %s2755_s4, %s2277_s11  ;;  %p2281_p5 = scmp.lt.u32.totalorder %s2277_s11, %s2755_s4 }
  0x4a   :  { %p2283_p6 = pnand %p2281_p5, %p2278_p4 }
  0x4c   :  { %2286 = shalt.err (!%p2283_p6)
}
  0x4d   :  { %s2287_s2 = scalar_lea.vmem %s71_s28, 512  ;;  %p2292_p8 = scmp.lt.s32.totalorder %s71_s28, %s71_s28 }
  0x4e   :  { %p2288_p7 = scmp.ne.s32.totalorder %s71_s28, %s2287_s2  ;;  %p2293_p9 = scmp.lt.s32.totalorder %s2287_s2, %s2287_s2 }
  0x50   :  { %p2294_p10 = por %p2293_p9, %p2292_p8 }
  0x52   :  { %p2295_p11 = pnand %p2294_p10, %p2288_p7 }
  0x54   :  { %2298 = shalt.err (!%p2295_p11)
}
  0x55   :  { %76 = dma.hbm_to_vmem [thread:$0]  %s2755_s4, 512, %s71_s28, [#allocation9], %s2355_s13, %s2355_s13, %s2356_s14  }
  0x56   :  { %s2299_s19 = scalar_lea.hbm %s2757_s6, 512 }
  0x57   :  { %p2300_p12 = scmp.ne.s32.totalorder %s2757_s6, %s2299_s19  ;;  %p2303_p13 = scmp.lt.u32.totalorder %s2299_s19, %s2757_s6 }
  0x59   :  { %p2305_p0 = pnand %p2303_p13, %p2300_p12 }
  0x5b   :  { %2308 = shalt.err (!%p2305_p0)
}
  0x5c   :  { %s2309_s24 = scalar_lea.vmem %s2483_s8, 512  ;;  %p2314_p2 = scmp.lt.s32.totalorder %s2483_s8, %s2483_s8 }
  0x5d   :  { %p2310_p1 = scmp.ne.s32.totalorder %s2483_s8, %s2309_s24  ;;  %p2315_p3 = scmp.lt.s32.totalorder %s2309_s24, %s2309_s24 }
  0x5f   :  { %p2316_p4 = por %p2315_p3, %p2314_p2 }
  0x61   :  { %p2317_p5 = pnand %p2316_p4, %p2310_p1 }
  0x63   :  { %2320 = shalt.err (!%p2317_p5)
}
  0x64   :  { %90 = dma.hbm_to_vmem [thread:$0]  %s2757_s6, 512, %s2483_s8, [#allocation12], %s2355_s13, %s2355_s13, %s2356_s14  }
  0x65   :  { %2343 = dma.done.wait [#allocation3], 256  }
  0x66   :  { %2344 = vsyncadd [#allocation3], 4294967040 }
  0x67   :  { %2345 = dma.done.wait [#allocation6], 768  }
  0x68   :  { %2346 = vsyncadd [#allocation6], 4294966528 }
  0x69   :  { %2347 = dma.done.wait [#allocation9], 1024  }
  0x6a   :  { %2348 = vsyncadd [#allocation9], 4294966272 }
  0x6b   :  { %2349 = dma.done.wait [#allocation12], 512  }
  0x6c   :  { %2350 = vsyncadd [#allocation12], 4294966784  ;;  %v197_v0 = vld [vmem:[#allocation8] sm:$0xff]  ;;  %v198_v1 = vld [vmem:[#allocation8 + $0x8] sm:$0xff]  ;;  %vm115_vm0 = vcmask 261120   ;;  %v2361_v14 = vmov 0.0  }
  0x6d   :  { %v111_v2 = vld [vmem:[#allocation7] sm:$0xff]  ;;  %v2117_v3 = vpack.c.bf16 %v198_v1, %v197_v0  ;;  %v112_v4 = vld [vmem:[#allocation7 + $0x8] sm:$0xff]  ;;  %v199_v5 = vld [vmem:[#allocation8 + $0x10] sm:$0xff]  ;;  %vm2362_vm1 = vmmov 0   ;;  %vm412_vm2 = vcmask 64512   ;;  %s2363_s6 = smov 120  }
  0x6e   :  { %v200_v6 = vld [vmem:[#allocation8 + $0x18] sm:$0xff]  ;;  %v2109_v7 = vpack.c.bf16 %v112_v4, %v111_v2  ;;  %v113_v9 = vld [vmem:[#allocation7 + $0x10] sm:$0xff]  ;;  %v109_v11 = vld [vmem:[#allocation2] sm:$0xff]  ;;  %s2364_s0 = smov 112   ;;  %s2365_s25 = smov 104   ;;  %vm1783_vm11 = vcmask 130048  }
  0x6f   :  { %v2121_v8 = vpack.c.bf16 %v200_v6, %v199_v5  ;;  %v114_v10 = vld [vmem:[#allocation7 + $0x18] sm:$0xff]  ;;  %2118 = vmatprep.subr.bf16.mxu1 %v2117_v3  ;;  %2004 = vmatprep.mubr.msk.f32.mxu1 %vm115_vm0, %v109_v11  ;;  %v110_v13 = vld [vmem:[#allocation2 + $0x8] sm:$0xff]  ;;  %v276_v15 = vld [vmem:[#allocation10] sm:$0xff]  ;;  %s2367_s29 = smov 24   ;;  %vm1786_vm12 = vcmask 195584   ;;  %s2368_s8 = smov [#allocation13]  }
  0x70   :  { %v2113_v12 = vpack.c.bf16 %v114_v10, %v113_v9  ;;  %2120 = vmatpush3.bf16.msra.mxu1 %v2117_v3  ;;  %2110 = vmatprep.subr.bf16.mxu0 %v2109_v7  ;;  %v277_v16 = vld [vmem:[#allocation10 + $0x8] sm:$0xff]  ;;  %v278_v18 = vld [vmem:[#allocation10 + $0x10] sm:$0xff]  ;;  %v279_v19 = vld [vmem:[#allocation10 + $0x18] sm:$0xff]  ;;  %s1881_s9 = sshll.u32 %s2368_s8, 4  ;;  %s1882_s9 = int_to_ptr.vmem [resolvable:$true] %s1881_s9 }
  0x71   :  { %2112 = vmatpush3.bf16.msra.mxu0 %v2109_v7  ;;  %2122 = vmatprep.subr.bf16.mxu1 %v2121_v8  ;;  %v2125_v17 = vpack.c.bf16 %v277_v16, %v276_v15  ;;  %v2129_v20 = vpack.c.bf16 %v279_v19, %v278_v18  ;;  %v1900_v38 = vld [vmem:[%s2756_s5] ss:$0 sm:$0xff]  ;;  %v410_v43 = vld [vmem:[#allocation5] sm:$0xff]  ;;  %v411_v48 = vld [vmem:[#allocation5 + $0x8] sm:$0xff]  ;;  %s2366_s5 = smov 16   ;;  %s2321_s10 = scalar_lea.vmem %s1882_s9, 256 }
  0x72   :  { %2114 = vmatprep.subr.bf16.mxu0 %v2113_v12  ;;  %1993 = vmatprep.mubr.msk.f32.mxu0 %vm115_vm0, %v109_v11  ;;  %p2322_p6 = scmp.ne.s32.totalorder %s1882_s9, %s2321_s10  ;;  %p2326_p7 = scmp.lt.s32.totalorder %s1882_s9, %s1882_s9 }
  0x73   :  { %p2327_p8 = scmp.lt.s32.totalorder %s2321_s10, %s2321_s10 }
  0x74   :  { %2124 = vmatpush3.bf16.msra.mxu1 %v2121_v8 }
  0x75   :  { %2116 = vmatpush3.bf16.msra.mxu0 %v2113_v12  ;;  %2018 = vmatprep.subr.mxu1 %v2361_v14  ;;  %p2328_p9 = por %p2327_p8, %p2326_p7 }
  0x76   :  { %2126 = vmatprep.subr.bf16.mxu0 %v2125_v17 }
  0x77   :  { %2005 = vmatmul.mubr.msk.f32.vlgmr.msra.gmra.mrb[0].mxu1 %vm115_vm0, %v110_v13  ;;  %p2329_p10 = pnand %p2328_p9, %p2322_p6 }
  0x78   :  { %1994 = vmatmul.mubr.msk.f32.vlgmr.msra.gmra.mrb[0].mxu0 %vm115_vm0, %v110_v13  ;;  %2020 = vmatprep.mubr.msk.f32.mxu1 %vm2362_vm1, %v2361_v14 }
  0x79   :  { %2015 = vmatprep.mubr.msk.f32.mxu0 %vm115_vm0, %v109_v11  ;;  %2128 = vmatpush3.bf16.msra.mxu0 %v2125_v17 }
  0x7a   :  { %2130 = vmatprep.subr.bf16.mxu0 %v2129_v20 }
  0x7d   :  { %2132 = vmatpush3.bf16.msra.mxu0 %v2129_v20 }
  0x7e   :  { %2038 = vmatprep.subr.mxu0 %v2361_v14 }
  0x80   :  { %2016 = vmatmul.mubr.msk.f32.vlgmr.msra.gmra.mrb[2].mxu0 %vm115_vm0, %v110_v13 }
  0x81   :  { %2040 = vmatprep.mubr.msk.f32.mxu0 %vm2362_vm1, %v2361_v14 }
 0x14a   :  { %v2006_v21 = vpop.f32.mrb[0].mxu1 }
 0x14b   :  { %380 = vrot.lane.b32.xlu1 %v2006_v21, %s2363_s6  ;;  %v267_v22 = vpop.f32.mrb[1].mxu1  ;;  %v1995_v23 = vpop.f32.mrb[0].mxu0 }
 0x14c   :  { %378 = vrot.lane.b32.xlu0 %v267_v22, %s2363_s6  ;;  %2019 = vmatpush3.xpose.msk.msra.mxu1 %vm412_vm2, %v267_v22  ;;  %v188_v24 = vpop.f32.mrb[1].mxu0 }
 0x14d   :  { %2023 = vmatprep.subr.mxu1 %v2361_v14 }
 0x14f   :  { %366 = vrot.lane.b32.xlu1 %v1995_v23, %s2363_s6  ;;  %2021 = vmatmul.mubr.msk.f32.vlgmr.msra.gmra.mrb[2].mxu1 %vm412_vm2, %v188_v24 }
 0x150   :  { %364 = vrot.lane.b32.xlu0 %v188_v24, %s2363_s6  ;;  %2024 = vmatpush3.xpose.msk.msra.mxu1 %vm412_vm2, %v2006_v21 }
 0x151   :  { %2025 = vmatprep.mubr.msk.f32.mxu1 %vm2362_vm1, %v2361_v14  ;;  %2028 = vmatprep.subr.mxu1 %v2361_v14 }
 0x153   :  { %384 = vrot.lane.b32.xlu1 %v2006_v21, %s2364_s0  ;;  %2026 = vmatmul.mubr.msk.f32.vlgmr.msra.gmra.mrb[4].mxu1 %vm412_vm2, %v1995_v23  ;;  %v2017_v37 = vpop.f32.mrb[2].mxu0 }
 0x154   :  { %382 = vrot.lane.b32.xlu0 %v267_v22, %s2364_s0  ;;  %2030 = vmatprep.mubr.msk.f32.mxu1 %vm2362_vm1, %v2361_v14  ;;  %v2587_v39 = vadd.f32 %v2017_v37, %v1900_v38  ;;  %v353_v40 = vpop.f32.mrb[3].mxu0 }
 0x155   :  { %v2589_v41 = vadd.f32 %v1900_v38, %v353_v40 }
 0x157   :  { %370 = vrot.lane.b32.xlu1 %v1995_v23, %s2364_s0 }
 0x158   :  { %368 = vrot.lane.b32.xlu0 %v188_v24, %s2364_s0 }
 0x15b   :  { %388 = vrot.lane.b32.xlu1 %v2006_v21, %s2365_s25 }
 0x15c   :  { %386 = vrot.lane.b32.xlu0 %v267_v22, %s2365_s25 }
 0x15f   :  { %374 = vrot.lane.b32.xlu1 %v1995_v23, %s2365_s25 }
 0x160   :  { %372 = vrot.lane.b32.xlu0 %v188_v24, %s2365_s25 }
 0x1bd   :  { %v381_v25 = vpop.permute.xlu1 %380 }
 0x1be   :  { %v379_v26 = vpop.permute.xlu0 %378 }
 0x1bf   :  { %2029 = vmatpush3.xpose.msk.msra.mxu1 %vm412_vm2, %v379_v26 }
 0x1c0   :  { %2033 = vmatprep.subr.mxu1 %v2361_v14 }
 0x1c1   :  { %v367_v27 = vpop.permute.xlu1 %366 }
 0x1c2   :  { %v365_v28 = vpop.permute.xlu0 %364 }
 0x1c3   :  { %2031 = vmatmul.mubr.msk.f32.vlgmr.msra.gmra.mrb[6].mxu1 %vm412_vm2, %v365_v28 }
 0x1c4   :  { %2034 = vmatpush3.xpose.msk.msra.mxu1 %vm412_vm2, %v381_v25  ;;  %2035 = vmatprep.mubr.msk.f32.mxu1 %vm2362_vm1, %v2361_v14 }
 0x1c5   :  { %v385_v29 = vpop.permute.xlu1 %384  ;;  %2043 = vmatprep.subr.mxu1 %v2361_v14 }
 0x1c6   :  { %v383_v30 = vpop.permute.xlu0 %382 }
 0x1c7   :  { %2036 = vmatmul.mubr.msk.f32.vlgmr.msra.gmra.mrb[8].mxu1 %vm412_vm2, %v367_v27  ;;  %2039 = vmatpush3.xpose.msk.msra.mxu0 %vm412_vm2, %v383_v30 }
 0x1c8   :  { %2044 = vmatpush3.xpose.msk.msra.mxu1 %vm412_vm2, %v385_v29  ;;  %2045 = vmatprep.mubr.msk.f32.mxu1 %vm2362_vm1, %v2361_v14 }
 0x1c9   :  { %v371_v31 = vpop.permute.xlu1 %370  ;;  %2053 = vmatprep.subr.mxu1 %v2361_v14  ;;  %2048 = vmatprep.subr.mxu0 %v2361_v14 }
 0x1ca   :  { %v369_v32 = vpop.permute.xlu0 %368 }
 0x1cb   :  { %2041 = vmatmul.mubr.msk.f32.vlgmr.msra.gmra.mrb[4].mxu0 %vm412_vm2, %v369_v32  ;;  %2046 = vmatmul.mubr.msk.f32.vlgmr.msra.gmra.mrb[10].mxu1 %vm412_vm2, %v371_v31 }
 0x1cc   :  { %2055 = vmatprep.mubr.msk.f32.mxu1 %vm2362_vm1, %v2361_v14  ;;  %2050 = vmatprep.mubr.msk.f32.mxu0 %vm2362_vm1, %v2361_v14 }
 0x1cd   :  { %v389_v33 = vpop.permute.xlu1 %388 }
 0x1ce   :  { %v387_v34 = vpop.permute.xlu0 %386  ;;  %2054 = vmatpush3.xpose.msk.msra.mxu1 %vm412_vm2, %v389_v33 }
 0x1cf   :  { %2049 = vmatpush3.xpose.msk.msra.mxu0 %vm412_vm2, %v387_v34  ;;  %2063 = vmatprep.subr.mxu1 %v2361_v14 }
 0x1d0   :  { %2058 = vmatprep.subr.mxu0 %v2361_v14 }
 0x1d1   :  { %v375_v35 = vpop.permute.xlu1 %374 }
 0x1d2   :  { %v373_v36 = vpop.permute.xlu0 %372  ;;  %2056 = vmatmul.mubr.msk.f32.vlgmr.msra.gmra.mrb[12].mxu1 %vm412_vm2, %v375_v35 }
 0x1d3   :  { %2051 = vmatmul.mubr.msk.f32.vlgmr.msra.gmra.mrb[6].mxu0 %vm412_vm2, %v373_v36  ;;  %2065 = vmatprep.mubr.msk.f32.mxu1 %vm2362_vm1, %v2361_v14 }
 0x1d4   :  { %2060 = vmatprep.mubr.msk.f32.mxu0 %vm2362_vm1, %v2361_v14  ;;  %2064 = vmatpush3.msra.mxu1 %v2587_v39 }
 0x1d5   :  { %2059 = vmatpush3.msra.mxu0 %v2589_v41  ;;  %2073 = vmatprep.subr.mxu1 %v2361_v14 }
 0x1d6   :  { %2068 = vmatprep.subr.mxu0 %v2361_v14 }
 0x222   :  { %v483_v42 = vpop.f32.mrb[2].mxu1 }
 0x223   :  { %v1045_v44 = vmul.f32 0.17677669, %v483_v42  ;;  %v2022_v45 = vpop.f32.mrb[3].mxu1  ;;  %v1005_v21 = vand.u32 2147483647, %v483_v42 }
 0x225   :  { %v2595_v46 = vadd.f32 %v1045_v44, %v410_v43  ;;  %v1013_v26 = vsel %vm412_vm2, %v1005_v21, -inf }
 0x226   :  { %v557_v47 = vpop.f32.mrb[4].mxu1 }
 0x227   :  { %v1046_v49 = vmul.f32 0.17677669, %v557_v47  ;;  %v2027_v50 = vpop.f32.mrb[5].mxu1  ;;  %v1061_v51 = vsel %vm412_vm2, %v2595_v46, -inf  ;;  %v1006_v25 = vand.u32 2147483647, %v557_v47 }
 0x228   :  { %1062 = vmax.xlane.f32.xlu0 %v1061_v51 }
 0x229   :  { %v2599_v52 = vadd.f32 %v1046_v49, %v411_v48  ;;  %v1016_v30 = vsel %vm412_vm2, %v1006_v25, -inf }
 0x22b   :  { %v1064_v53 = vsel %vm412_vm2, %v2599_v52, -inf }
 0x22c   :  { %1065 = vmax.xlane.f32.xlu1 %v1064_v53 }
 0x296   :  { %v631_v54 = vpop.f32.mrb[6].mxu1 }
 0x297   :  { %v1047_v55 = vmul.f32 0.17677669, %v631_v54  ;;  %v2032_v56 = vpop.f32.mrb[7].mxu1  ;;  %v1007_v29 = vand.u32 2147483647, %v631_v54 }
 0x299   :  { %v2603_v57 = vadd.f32 %v1047_v55, %v410_v43  ;;  %v1019_v33 = vsel %vm412_vm2, %v1007_v29, -inf }
 0x29a   :  { %v705_v58 = vpop.f32.mrb[8].mxu1 }
 0x29b   :  { %v1048_v59 = vmul.f32 0.17677669, %v705_v58  ;;  %v2037_v60 = vpop.f32.mrb[9].mxu1  ;;  %v1067_v61 = vsel %vm412_vm2, %v2603_v57, -inf  ;;  %v1008_v19 = vand.u32 2147483647, %v705_v58 }
 0x29c   :  { %1068 = vmax.xlane.f32.xlu0 %v1067_v61 }
 0x29d   :  { %v2607_v62 = vadd.f32 %v1048_v59, %v411_v48  ;;  %v1022_v24 = vsel %vm412_vm2, %v1008_v19, -inf }
 0x29e   :  { %v779_v63 = vpop.f32.mrb[4].mxu0  ;;  %v853_v0 = vpop.f32.mrb[10].mxu1 }
 0x29f   :  { %v1049_v1 = vmul.f32 0.17677669, %v779_v63  ;;  %v1050_v2 = vmul.f32 0.17677669, %v853_v0  ;;  %v2042_v3 = vpop.f32.mrb[5].mxu0  ;;  %v2047_v4 = vpop.f32.mrb[11].mxu1 }
 0x2a0   :  { %v1070_v5 = vsel %vm412_vm2, %v2607_v62, -inf  ;;  %v1010_v23 = vand.u32 2147483647, %v853_v0  ;;  %v1009_v32 = vand.u32 2147483647, %v779_v63 }
 0x2a1   :  { %1071 = vmax.xlane.f32.xlu0 %v1070_v5  ;;  %v2611_v6 = vadd.f32 %v1049_v1, %v410_v43  ;;  %v2613_v7 = vadd.f32 %v1050_v2, %v411_v48 }
 0x2a2   :  { %v1028_v28 = vsel %vm412_vm2, %v1010_v23, -inf  ;;  %v1025_v35 = vsel %vm412_vm2, %v1009_v32, -inf }
 0x2a3   :  { %v1073_v8 = vsel %vm412_vm2, %v2611_v6, -inf  ;;  %v1076_v9 = vsel %vm412_vm2, %v2613_v7, -inf }
 0x2a4   :  { %1074 = vmax.xlane.f32.xlu1 %v1073_v8 }
 0x2a5   :  { %1077 = vmax.xlane.f32.xlu0 %v1076_v9  ;;  %v1001_v10 = vpop.f32.mrb[12].mxu1 }
 0x2a6   :  { %v1052_v11 = vmul.f32 0.17677669, %v1001_v10  ;;  %v927_v12 = vpop.f32.mrb[6].mxu0  ;;  %v2057_v13 = vpop.f32.mrb[13].mxu1  ;;  %v1012_v27 = vand.u32 2147483647, %v1001_v10 }
 0x2a7   :  { %v1051_v15 = vmul.f32 0.17677669, %v927_v12  ;;  %v2052_v16 = vpop.f32.mrb[7].mxu0  ;;  %v1011_v34 = vand.u32 2147483647, %v927_v12 }
 0x2a8   :  { %v2619_v17 = vadd.f32 %v1052_v11, %v411_v48  ;;  %v1034_v31 = vsel %vm412_vm2, %v1012_v27, -inf }
 0x2a9   :  { %v2621_v18 = vadd.f32 %v1051_v15, %v410_v43  ;;  %v1031_v36 = vsel %vm412_vm2, %v1011_v34, -inf }
 0x2aa   :  { %v1082_v20 = vsel %vm412_vm2, %v2619_v17, -inf }
 0x2ab   :  { %1083 = vmax.xlane.f32.xlu0 %v1082_v20  ;;  %v1079_v22 = vsel %vm412_vm2, %v2621_v18, -inf }
 0x2ac   :  { %1080 = vmax.xlane.f32.xlu1 %v1079_v22 }
 0x2af   :  { %1023 = vmax.xlane.f32.xlu0 %v1022_v24 }
 0x2b0   :  { %1014 = vmax.xlane.f32.xlu1 %v1013_v26 }
 0x2b3   :  { %1029 = vmax.xlane.f32.xlu0 %v1028_v28 }
 0x2b4   :  { %1017 = vmax.xlane.f32.xlu1 %v1016_v30 }
 0x2b5   :  { %v1063_v42 = vpop.xlane.xlu0 %1062 }
 0x2b6   :  { %v1085_v43 = vsub.f32 %v2595_v46, %v1063_v42 }
 0x2b7   :  { %1035 = vmax.xlane.f32.xlu0 %v1034_v31 }
 0x2b8   :  { %1020 = vmax.xlane.f32.xlu1 %v1019_v33  ;;  %v1093_v45 = vmul.f32 1.442695, %v1085_v43 }
 0x2b9   :  { %v1066_v37 = vpop.xlane.xlu1 %1065 }
 0x2ba   :  { %v1086_v38 = vsub.f32 %v2599_v52, %v1066_v37 }
 0x2bc   :  { %1026 = vmax.xlane.f32.xlu1 %v1025_v35  ;;  %v1095_v40 = vmul.f32 1.442695, %v1086_v38 }
 0x2be   :  { %2157 = vpow2.f32 %v1095_v40 }
 0x2bf   :  { %2159 = vpow2.f32 %v1093_v45 }
 0x2c0   :  { %1032 = vmax.xlane.f32.xlu1 %v1031_v36 }
 0x2c8   :  { %v2645_v44 = vpop.eup %2157 }
 0x2c9   :  { %v1112_v47 = vsel %vm412_vm2, %v2645_v44, 0.0  ;;  %v2649_v48 = vpop.eup %2159 }
 0x2ca   :  { %v1109_v49 = vsel %vm412_vm2, %v2649_v48, 0.0 }
 0x2cd   :  { %394 = vrot.lane.b32.xlu0 %v2587_v39, %s2363_s6 }
 0x2d1   :  { %392 = vrot.lane.b32.xlu1 %v2589_v41, %s2363_s6 }
 0x2d5   :  { %398 = vrot.lane.b32.xlu1 %v2589_v41, %s2364_s0 }
 0x2d9   :  { %400 = vrot.lane.b32.xlu1 %v2587_v39, %s2364_s0 }
 0x2ec   :  { %1113 = vadd.xlane.f32.xlu0 %v1112_v47 }
 0x2fd   :  { %1110 = vadd.xlane.f32.xlu1 %v1109_v49 }
 0x329   :  { %v1069_v50 = vpop.xlane.xlu0 %1068 }
 0x32a   :  { %v1087_v51 = vsub.f32 %v2603_v57, %v1069_v50 }
 0x32c   :  { %v1097_v52 = vmul.f32 1.442695, %v1087_v51 }
 0x32e   :  { %2161 = vpow2.f32 %v1097_v52  ;;  %v1072_v46 = vpop.xlane.xlu0 %1071 }
 0x32f   :  { %v1088_v53 = vsub.f32 %v2607_v62, %v1072_v46 }
 0x331   :  { %v1099_v54 = vmul.f32 1.442695, %v1088_v53  ;;  %v1075_v55 = vpop.xlane.xlu1 %1074 }
 0x332   :  { %v1089_v56 = vsub.f32 %v2611_v6, %v1075_v55  ;;  %v1078_v59 = vpop.xlane.xlu0 %1077 }
 0x333   :  { %2163 = vpow2.f32 %v1099_v54  ;;  %v1090_v61 = vsub.f32 %v2613_v7, %v1078_v59 }
 0x334   :  { %v1101_v58 = vmul.f32 1.442695, %v1089_v56 }
 0x335   :  { %v1103_v62 = vmul.f32 1.442695, %v1090_v61 }
 0x336   :  { %2165 = vpow2.f32 %v1101_v58 }
 0x338   :  { %v2656_v60 = vpop.eup %2161  ;;  %v1084_v63 = vpop.xlane.xlu0 %1083 }
 0x339   :  { %v1081_v0 = vpop.xlane.xlu1 %1080  ;;  %v1115_v57 = vsel %vm412_vm2, %v2656_v60, 0.0  ;;  %v1092_v2 = vsub.f32 %v2619_v17, %v1084_v63 }
 0x33a   :  { %v1091_v1 = vsub.f32 %v2621_v18, %v1081_v0  ;;  %1116 = vadd.xlane.f32.xlu1 %v1115_v57 }
 0x33b   :  { %v1107_v7 = vmul.f32 1.442695, %v1092_v2 }
 0x33c   :  { %v1105_v3 = vmul.f32 1.442695, %v1091_v1  ;;  %v1024_v18 = vpop.xlane.xlu0 %1023 }
 0x33d   :  { %v2663_v4 = vpop.eup %2163  ;;  %v1015_v16 = vpop.xlane.xlu1 %1014  ;;  %vm1040_vm6 = vcmp.eq.f32.partialorder %v1024_v18, 0.0 }
 0x33e   :  { %2167 = vpow2.f32 %v1105_v3  ;;  %v1118_v5 = vsel %vm412_vm2, %v2663_v4, 0.0  ;;  %vm1037_vm4 = vcmp.eq.f32.partialorder %v1015_v16, 0.0 }
 0x33f   :  { %1119 = vadd.xlane.f32.xlu0 %v1118_v5  ;;  %2169 = vpow2.f32 %v1103_v62  ;;  %v1790_v5 = vld [vmem:[#allocation11 + $0x8] sm:$0xff] }
 0x340   :  { %v2667_v6 = vpop.eup %2165  ;;  %2171 = vpow2.f32 %v1107_v7  ;;  %v2687_v20 = vpop.xlane.xlu0 %1029 }
 0x341   :  { %v1121_v8 = vsel %vm412_vm2, %v2667_v6, 0.0  ;;  %v1018_v17 = vpop.xlane.xlu1 %1017  ;;  %vm1042_vm9 = vcmp.eq.f32.partialorder %v2687_v20, 0.0 }
 0x342   :  { %1122 = vadd.xlane.f32.xlu1 %v1121_v8  ;;  %vm1038_vm3 = vcmp.eq.f32.partialorder %v1018_v17, 0.0 }
 0x344   :  { %v2689_v22 = vpop.xlane.xlu0 %1035 }
 0x345   :  { %v1021_v19 = vpop.xlane.xlu1 %1020  ;;  %vm1044_vm10 = vcmp.eq.f32.partialorder %v2689_v22, 0.0 }
 0x346   :  { %vm1039_vm5 = vcmp.eq.f32.partialorder %v1021_v19, 0.0 }
 0x348   :  { %v2671_v9 = vpop.eup %2167  ;;  %v395_v24 = vpop.permute.xlu0 %394 }
 0x349   :  { %v1127_v10 = vsel %vm412_vm2, %v2671_v9, 0.0  ;;  %v2675_v11 = vpop.eup %2169  ;;  %v1027_v21 = vpop.xlane.xlu1 %1026 }
 0x34a   :  { %1128 = vadd.xlane.f32.xlu0 %v1127_v10  ;;  %v1124_v12 = vsel %vm412_vm2, %v2675_v11, 0.0  ;;  %v2679_v13 = vpop.eup %2171  ;;  %vm1041_vm7 = vcmp.eq.f32.partialorder %v1027_v21, 0.0  ;;  %v1792_v10 = vld [vmem:[#allocation11 + $0x18] sm:$0xff] }
 0x34b   :  { %v1130_v15 = vsel %vm412_vm2, %v2679_v13, 0.0 }
 0x34d   :  { %v2691_v23 = vpop.xlane.xlu1 %1032 }
 0x34e   :  { %1125 = vadd.xlane.f32.xlu0 %v1124_v12  ;;  %vm1043_vm8 = vcmp.eq.f32.partialorder %v2691_v23, 0.0 }
 0x351   :  { %v393_v26 = vpop.permute.xlu1 %392 }
 0x352   :  { %1131 = vadd.xlane.f32.xlu0 %v1130_v15 }
 0x353   :  { %406 = vrot.lane.b32.xlu1 %v2587_v39, %s2365_s25 }
 0x355   :  { %v399_v27 = vpop.permute.xlu1 %398 }
 0x359   :  { %v401_v29 = vpop.permute.xlu1 %400 }
 0x368   :  { %404 = vrot.lane.b32.xlu0 %v2589_v41, %s2365_s25 }
 0x379   :  { %v1114_v25 = vpop.xlane.xlu0 %1113 }
 0x37a   :  { %2173 = vrcp.f32 %v1114_v25 }
 0x384   :  { %v2174_v39 = vpop.eup %2173 }
 0x385   :  { %v1142_v28 = vmul.f32 %v2174_v39, %v2645_v44 }
 0x387   :  { %v1166_v30 = vsel %vm1038_vm3, 0.0, %v1142_v28 }
 0x388   :  { %2066 = vmatmul.mubr.msk.f32.vlgmr.msra.gmra.mrb[14].mxu1 %vm412_vm2, %v1166_v30 }
 0x389   :  { %2074 = vmatpush3.msra.mxu1 %v395_v24  ;;  %2075 = vmatprep.mubr.msk.f32.mxu1 %vm2362_vm1, %v2361_v14 }
 0x38a   :  { %v1111_v41 = vpop.xlane.xlu1 %1110  ;;  %2083 = vmatprep.subr.mxu1 %v2361_v14 }
 0x38b   :  { %2175 = vrcp.f32 %v1111_v41 }
 0x395   :  { %v2176_v31 = vpop.eup %2175 }
 0x396   :  { %v1141_v32 = vmul.f32 %v2176_v31, %v2649_v48 }
 0x398   :  { %v1165_v33 = vsel %vm1037_vm4, 0.0, %v1141_v32 }
 0x399   :  { %2061 = vmatmul.mubr.msk.f32.vlgmr.msra.gmra.mrb[8].mxu0 %vm412_vm2, %v1165_v33 }
 0x39a   :  { %2069 = vmatpush3.msra.mxu0 %v393_v26  ;;  %2070 = vmatprep.mubr.msk.f32.mxu0 %vm2362_vm1, %v2361_v14 }
 0x39b   :  { %2078 = vmatprep.subr.mxu0 %v2361_v14 }
 0x3c7   :  { %v1117_v34 = vpop.xlane.xlu1 %1116 }
 0x3c8   :  { %2177 = vrcp.f32 %v1117_v34 }
 0x3cc   :  { %v1120_v35 = vpop.xlane.xlu0 %1119 }
 0x3cd   :  { %2179 = vrcp.f32 %v1120_v35 }
 0x3cf   :  { %v1123_v36 = vpop.xlane.xlu1 %1122 }
 0x3d0   :  { %2181 = vrcp.f32 %v1123_v36 }
 0x3d2   :  { %v2178_v37 = vpop.eup %2177 }
 0x3d3   :  { %v1143_v38 = vmul.f32 %v2178_v37, %v2656_v60  ;;  %v407_v60 = vpop.permute.xlu1 %406 }
 0x3d5   :  { %v1167_v40 = vsel %vm1039_vm5, 0.0, %v1143_v38 }
 0x3d6   :  { %2071 = vmatmul.mubr.msk.f32.vlgmr.msra.gmra.mrb[10].mxu0 %vm412_vm2, %v1167_v40 }
 0x3d7   :  { %v2180_v42 = vpop.eup %2179  ;;  %2079 = vmatpush3.msra.mxu0 %v399_v27  ;;  %v1129_v43 = vpop.xlane.xlu0 %1128  ;;  %2080 = vmatprep.mubr.msk.f32.mxu0 %vm2362_vm1, %v2361_v14 }
 0x3d8   :  { %2183 = vrcp.f32 %v1129_v43  ;;  %v1144_v44 = vmul.f32 %v2180_v42, %v2663_v4  ;;  %2088 = vmatprep.subr.mxu0 %v2361_v14  ;;  %v1789_v4 = vld [vmem:[#allocation11] sm:$0xff] }
 0x3d9   :  { %v2133_v7 = vpack.c.bf16 %v1790_v5, %v1789_v4 }
 0x3da   :  { %v2182_v45 = vpop.eup %2181  ;;  %v1168_v47 = vsel %vm1040_vm6, 0.0, %v1144_v44 }
 0x3db   :  { %2076 = vmatmul.mubr.msk.f32.vlgmr.msra.gmra.mrb[16].mxu1 %vm412_vm2, %v1168_v47  ;;  %v1126_v48 = vpop.xlane.xlu0 %1125  ;;  %v1145_v49 = vmul.f32 %v2182_v45, %v2667_v6 }
 0x3dc   :  { %2084 = vmatpush3.msra.mxu1 %v401_v29  ;;  %2185 = vrcp.f32 %v1126_v48  ;;  %2085 = vmatprep.mubr.msk.f32.mxu1 %vm2362_vm1, %v2361_v14 }
 0x3dd   :  { %v1169_v50 = vsel %vm1041_vm7, 0.0, %v1145_v49  ;;  %2093 = vmatprep.subr.mxu1 %v2361_v14 }
 0x3de   :  { %2081 = vmatmul.mubr.msk.f32.vlgmr.msra.gmra.mrb[12].mxu0 %vm412_vm2, %v1169_v50 }
 0x3df   :  { %v1132_v51 = vpop.xlane.xlu0 %1131  ;;  %2090 = vmatprep.mubr.msk.f32.mxu0 %vm2362_vm1, %v2361_v14 }
 0x3e0   :  { %2187 = vrcp.f32 %v1132_v51 }
 0x3e2   :  { %v2184_v52 = vpop.eup %2183 }
 0x3e3   :  { %v405_v46 = vpop.permute.xlu0 %404  ;;  %v1147_v53 = vmul.f32 %v2184_v52, %v2671_v9  ;;  %v1791_v9 = vld [vmem:[#allocation11 + $0x10] sm:$0xff] }
 0x3e4   :  { %2089 = vmatpush3.msra.mxu0 %v405_v46  ;;  %v2137_v12 = vpack.c.bf16 %v1792_v10, %v1791_v9 }
 0x3e5   :  { %v1171_v54 = vsel %vm1043_vm8, 0.0, %v1147_v53  ;;  %2134 = vmatprep.subr.bf16.mxu0 %v2133_v7 }
 0x3e6   :  { %v2186_v55 = vpop.eup %2185  ;;  %2091 = vmatmul.mubr.msk.f32.vlgmr.msra.gmra.mrb[14].mxu0 %vm412_vm2, %v1171_v54 }
 0x3e7   :  { %v1146_v56 = vmul.f32 %v2186_v55, %v2675_v11  ;;  %2136 = vmatpush3.bf16.msra.mxu0 %v2133_v7 }
 0x3e8   :  { %2138 = vmatprep.subr.bf16.mxu0 %v2137_v12 }
 0x3e9   :  { %v1170_v58 = vsel %vm1042_vm9, 0.0, %v1146_v56 }
 0x3ea   :  { %v2188_v59 = vpop.eup %2187  ;;  %2086 = vmatmul.mubr.msk.f32.vlgmr.msra.gmra.mrb[18].mxu1 %vm412_vm2, %v1170_v58 }
 0x3eb   :  { %2094 = vmatpush3.msra.mxu1 %v407_v60  ;;  %2095 = vmatprep.mubr.msk.f32.mxu1 %vm2362_vm1, %v2361_v14  ;;  %v1148_v61 = vmul.f32 %v2188_v59, %v2679_v13 }
 0x3ec   :  { %2140 = vmatpush3.bf16.msra.mxu0 %v2137_v12 }
 0x3ed   :  { %v1172_v63 = vsel %vm1044_vm10, 0.0, %v1148_v61 }
 0x3ee   :  { %2096 = vmatmul.mubr.msk.f32.vlgmr.msra.gmra.mrb[20].mxu1 %vm412_vm2, %v1172_v63 }
 0x45b   :  { %v1315_v0 = vpop.f32.mrb[14].mxu1 }
 0x45c   :  { %v2067_v57 = vpop.f32.mrb[15].mxu1 }
 0x46c   :  { %v1242_v1 = vpop.f32.mrb[8].mxu0 }
 0x46d   :  { %v2062_v62 = vpop.f32.mrb[9].mxu0 }
 0x4a9   :  { %v1388_v2 = vpop.f32.mrb[10].mxu0 }
 0x4aa   :  { %1759 = vrot.lane.b32.xlu0 %v1388_v2, %s2356_s14  ;;  %v2072_v3 = vpop.f32.mrb[11].mxu0 }
 0x4ae   :  { %v1461_v6 = vpop.f32.mrb[16].mxu1 }
 0x4af   :  { %v2077_v14 = vpop.f32.mrb[17].mxu1  ;;  %1761 = vrot.lane.b32.xlu1 %v1461_v6, %s2356_s14 }
 0x4b1   :  { %v1534_v8 = vpop.f32.mrb[12].mxu0 }
 0x4b2   :  { %1767 = vrot.lane.b32.xlu0 %v1534_v8, %s2366_s5  ;;  %v2082_v11 = vpop.f32.mrb[13].mxu0 }
 0x4b9   :  { %v1680_v13 = vpop.f32.mrb[14].mxu0 }
 0x4ba   :  { %1775 = vrot.lane.b32.xlu0 %v1680_v13, %s2367_s29  ;;  %v2092_v15 = vpop.f32.mrb[15].mxu0 }
 0x4bd   :  { %v1607_v16 = vpop.f32.mrb[18].mxu1 }
 0x4be   :  { %1769 = vrot.lane.b32.xlu1 %v1607_v16, %s2366_s5  ;;  %v2087_v17 = vpop.f32.mrb[19].mxu1 }
 0x4c1   :  { %v1753_v18 = vpop.f32.mrb[20].mxu1 }
 0x4c2   :  { %1777 = vrot.lane.b32.xlu1 %v1753_v18, %s2367_s29  ;;  %v2097_v19 = vpop.f32.mrb[21].mxu1 }
 0x51c   :  { %v1760_v20 = vpop.permute.xlu0 %1759 }
 0x51d   :  { %v1781_v22 = vsel %vm412_vm2, %v1242_v1, %v1760_v20 }
 0x521   :  { %v1762_v23 = vpop.permute.xlu1 %1761 }
 0x522   :  { %v1782_v39 = vsel %vm412_vm2, %v1315_v0, %v1762_v23 }
 0x524   :  { %v1768_v21 = vpop.permute.xlu0 %1767 }
 0x525   :  { %v1784_v24 = vsel %vm1783_vm11, %v1781_v22, %v1768_v21 }
 0x52c   :  { %v1776_v25 = vpop.permute.xlu0 %1775 }
 0x52d   :  { %v1787_v26 = vsel %vm1786_vm12, %v1784_v24, %v1776_v25 }
 0x52e   :  { %2106 = vmatprep.mubr.msk.f32.mxu0 %vm115_vm0, %v1787_v26 }
 0x530   :  { %v1770_v27 = vpop.permute.xlu1 %1769 }
 0x531   :  { %v1785_v28 = vsel %vm1783_vm11, %v1782_v39, %v1770_v27 }
 0x534   :  { %v1778_v29 = vpop.permute.xlu1 %1777 }
 0x535   :  { %v1788_v30 = vsel %vm1786_vm12, %v1785_v28, %v1778_v29 }
 0x536   :  { %2107 = vmatmul.mubr.msk.f32.vlgmr.msra.gmra.mrb[16].mxu0 %vm115_vm0, %v1788_v30 }
 0x609   :  { %v2108_v41 = vpop.f32.mrb[16].mxu0 }
 0x60a   :  { %1875 = vst.msk [vmem:[#allocation13 + $0x8] sm:$0xff] %vm115_vm0, %v2108_v41  ;;  %v1865_v31 = vpop.f32.mrb[17].mxu0 }
 0x60b   :  { %1874 = vst.msk [vmem:[#allocation13] sm:$0xff] %vm115_vm0, %v1865_v31 }
 0x60c   :  { %2332 = shalt.err (!%p2329_p10)
}
 0x60d   :  { %s2333_s15 = scalar_lea.hbm %s2758_s7, 256 }
 0x60e   :  { %p2334_p11 = scmp.ne.s32.totalorder %s2758_s7, %s2333_s15  ;;  %p2337_p12 = scmp.lt.u32.totalorder %s2333_s15, %s2758_s7 }
 0x610   :  { %p2339_p13 = pnand %p2337_p12, %p2334_p11 }
 0x612   :  { %2342 = shalt.err (!%p2339_p13)
}
 0x613   :  { %1887 = dma.vmem_to_hbm [thread:$0]  %s1882_s9, 256, %s2758_s7, [#allocation4], %s2355_s13, %s2355_s13, %s2356_s14  }
 0x614   :  { %2351 = dma.done.wait [#allocation4], 256  }
 0x615   :  { %2352 = vsyncadd [#allocation4], 4294967040 }
 0x616   :  { %1891 = vsyncpa [#allocation3], 1 }
 0x617   :  { %1892 = vsyncpa [#allocation6], 1 }
 0x618   :  { %1893 = vsyncpa [#allocation9], 1 }
 0x619   :  { %1894 = vsyncpa [#allocation12], 1 }
 0x61a   :  { %1895 = vsyncpa [#allocation4], 1 }

</bundles_post_ra>
